<compile_context>
chip_gen: v6e
topology: v6e:2x2x1
jax: 0.10.0
libtpu: 0.0.40
codegen_flags: <defaults>
</compile_context>

<pallas_src>
import numpy as np
import jax
import jax.numpy as jnp
from jax.experimental import pallas as pl
from jax.experimental.pallas import tpu as pltpu

MAX_BLUR = 20.0
MIN_BLUR = 0.5
MIN_SCALE = 0.0


def _dct_matrix(n: int) -> np.ndarray:
    """Orthonormal DCT-II matrix D such that dct(v, norm='ortho') = D @ v."""
    k = np.arange(n)[:, None].astype(np.float64)
    m = np.arange(n)[None, :].astype(np.float64)
    d = np.cos(np.pi * (2.0 * m + 1.0) * k / (2.0 * n)) * np.sqrt(2.0 / n)
    d[0, :] *= 1.0 / np.sqrt(2.0)
    return d.astype(np.float32)


def dct_blur_kernel(x_ref, mats_ref, scale_ref, o_ref):
    # x_ref:     (1, TC, HW)  -> TC flattened images (rows) of one batch element
    # mats_ref:  (2, HW, HW)  -> stacked [K^T, K], K = kron(D, D)
    # scale_ref: (1, 1, HW)   -> per-batch flattened frequency-domain scale
    x = x_ref[0].astype(jnp.float32)                          # (TC, HW)
    kt = mats_ref[0]                                          # (HW, HW)
    k = mats_ref[1]                                           # (HW, HW)
    s = scale_ref[0]                                          # (1, HW)

    # Forward 2-D DCT: rows of f are K @ vec(image)  <=>  f = x @ K^T.
    f = jnp.dot(x, kt, preferred_element_type=jnp.float32)    # (TC, HW)
    # Frequency-domain blur (per-batch scale, shared across channels/rows).
    g = f * s
    # Inverse 2-D DCT: rows of y are K^T @ vec(g)  <=>  y = g @ K.
    y = jnp.dot(g, k, preferred_element_type=jnp.float32)     # (TC, HW)

    o_ref[0] = y.astype(o_ref.dtype)


def _pick_channel_tile(C: int, HW: int,
                       itemsize: int = 4,
                       budget_bytes: int = 16 * 1024 * 1024) -> int:
    """Largest channel tile whose VMEM footprint fits the budget.

    Uses the *padded* slab size (sublanes rounded to 8, lanes to 128) and
    accounts for double-buffered input + output slabs (4 slabs total), so it
    is safe for v7x's 64 MiB VMEM / 32 MiB scoped default."""
    lanes = ((HW + 127) // 128) * 128

    def slab_bytes(tc: int) -> int:
        return ((tc + 7) // 8) * 8 * lanes * itemsize

    if 4 * slab_bytes(C) <= budget_bytes:
        return C
    best_any = 1
    best_8 = None
    for tc in range(1, C):
        if C % tc != 0 or 4 * slab_bytes(tc) > budget_bytes:
            continue
        best_any = max(best_any, tc)
        if tc % 8 == 0:
            best_8 = tc
    return best_8 if best_8 is not None else best_any


def dct_blur(x: jax.Array, t: jax.Array,
             max_blur: float = MAX_BLUR,
             min_blur: float = MIN_BLUR,
             min_scale: float = MIN_SCALE) -> jax.Array:
    """Pallas implementation of DCTBlur.forward for 4-D NCHW input."""
    assert x.ndim == 4, "this kernel implements the 4-D (NCHW) path"
    B, C, H, W = x.shape
    assert H == W, "DCTBlur uses a square image_size"
    HW = H * W

    # Deterministic "parameters" (module __init__ equivalents).
    D_np = _dct_matrix(H)
    K_np = np.kron(D_np, D_np).astype(np.float32)             # (HW, HW)
    mats = jnp.asarray(np.stack([K_np.T.copy(), K_np], axis=0))  # (2, HW, HW)

    freqs = np.pi * np.linspace(0, H - 1, H, dtype=np.float64) / H
    fsq = jnp.asarray((freqs[:, None] ** 2 + freqs[None, :] ** 2).astype(np.float32))

    # schedule(t) -> tau -> thresholded frequency fade, precomputed per batch.
    sigmas = jnp.exp(np.log(min_blur) * (1.0 - t) + np.log(max_blur) * t)
    tau = (sigmas.astype(jnp.float32) ** 2) / 2.0              # (B,)
    fade = jnp.exp(-fsq[None, :, :] * tau[:, None, None])      # (B, H, W)
    fade = jnp.where(fade < 0.01, jnp.float32(0.0), fade)
    scale = (fade * (1.0 - min_scale) + min_scale).astype(jnp.float32)
    scale = scale.reshape(B, 1, HW)                            # (B, 1, HW)

    # Free, contiguous lane-dense view of the images.
    x2d = x.reshape(B, C, HW)

    TC = _pick_channel_tile(C, HW, itemsize=jnp.dtype(jnp.float32).itemsize)
    grid = (B, C // TC)

    out = pl.pallas_call(
        dct_blur_kernel,
        out_shape=jax.ShapeDtypeStruct((B, C, HW), x.dtype),
        grid_spec=pl.GridSpec(
            grid=grid,
            in_specs=[
                pl.BlockSpec((1, TC, HW), lambda b, c: (b, c, 0)),   # x slab
                pl.BlockSpec((2, HW, HW), lambda b, c: (0, 0, 0)),   # [K^T, K]
                pl.BlockSpec((1, 1, HW), lambda b, c: (b, 0, 0)),    # scale (b only)
            ],
            out_specs=pl.BlockSpec((1, TC, HW), lambda b, c: (b, c, 0)),
        ),
        compiler_params=pltpu.CompilerParams(
            dimension_semantics=("parallel", "parallel"),
        ),
    )(x2d, mats, scale)
    return out.reshape(B, C, H, W)


def dct_blur_ref(x, t):
    """Pure-JAX reference (mirrors the PyTorch forward, in f32)."""
    B, C, H, W = x.shape
    D = jnp.asarray(_dct_matrix(H))
    freqs = np.pi * np.linspace(0, H - 1, H, dtype=np.float64) / H
    fsq = jnp.asarray((freqs[:, None] ** 2 + freqs[None, :] ** 2).astype(np.float32))
    sigmas = jnp.exp(np.log(MIN_BLUR) * (1.0 - t) + np.log(MAX_BLUR) * t)
    tau = (sigmas ** 2 / 2.0)[:, None, None, None]              # [B,1,1,1]
    fade = jnp.exp(-fsq * tau)                                  # [B,1,H,W]
    fade = jnp.where(fade < 0.01, 0.0, fade)
    scale = fade * (1.0 - MIN_SCALE) + MIN_SCALE
    x32 = x.astype(jnp.float32)
    dct = jnp.einsum('ik,bckl,jl->bcij', D, x32, D)             # D x D^T
    bdct = dct * scale
    out = jnp.einsum('ki,bckl,lj->bcij', D, bdct, D)            # D^T y D
    return out.astype(x.dtype)


if __name__ == "__main__":
    key = jax.random.PRNGKey(0)
    kx, kt = jax.random.split(key)
    B, C, H, W = 2, 4, 16, 16
    x = jax.random.normal(kx, (B, C, H, W), dtype=jnp.float32)
    t = jax.random.uniform(kt, (B,), dtype=jnp.float32)

    out = jax.block_until_ready(dct_blur(x, t))

    ref = dct_blur_ref(x, t)
    max_err = float(jnp.max(jnp.abs(out - ref)))
    assert out.shape == (B, C, H, W) and out.dtype == x.dtype
    assert max_err < 2e-2, f"mismatch vs reference: {max_err}"
    print("KERNEL_OK")
</pallas_src>

<mosaic_0001>
module attributes {stable_mosaic.version = 11 : i64} {
  func.func @dct_blur_kernel(%arg0: i32, %arg1: i32, %arg2: memref<1x4x256xf32, #tpu.memory_space<vmem>>, %arg3: memref<2x256x256xf32, #tpu.memory_space<vmem>>, %arg4: memref<1x1x256xf32, #tpu.memory_space<vmem>>, %arg5: memref<1x4x256xf32, #tpu.memory_space<vmem>>) attributes {dimension_semantics = [#tpu.dimension_semantics<parallel>, #tpu.dimension_semantics<parallel>], iteration_bounds = array<i64: 2, 1>, scalar_prefetch = 0 : i64, scratch_operands = 0 : i64, tpu.core_type = #tpu.core_type<tc>, window_params = [{transform_indices = @transform_0, window_bounds = array<i64: 1, 4, 256>}, {pipeline_mode = #tpu.pipeline_mode<synchronous>, transform_indices = @transform_1, window_bounds = array<i64: 2, 256, 256>}, {transform_indices = @transform_2, window_bounds = array<i64: 1, 1, 256>}, {transform_indices = @transform_3, window_bounds = array<i64: 1, 4, 256>}]} {
    %c0 = arith.constant 0 : index
    %c0_0 = arith.constant 0 : index
    %c0_1 = arith.constant 0 : index
    %0 = vector.load %arg2[%c0, %c0_0, %c0_1] : memref<1x4x256xf32, #tpu.memory_space<vmem>>, vector<1x4x256xf32>
    %1 = vector.shape_cast %0 : vector<1x4x256xf32> to vector<4x256xf32>
    %c0_2 = arith.constant 0 : index
    %c0_3 = arith.constant 0 : index
    %c0_4 = arith.constant 0 : index
    %2 = vector.load %arg3[%c0_2, %c0_3, %c0_4] : memref<2x256x256xf32, #tpu.memory_space<vmem>>, vector<1x256x256xf32>
    %3 = vector.shape_cast %2 : vector<1x256x256xf32> to vector<256x256xf32>
    %c1 = arith.constant 1 : index
    %c0_5 = arith.constant 0 : index
    %c0_6 = arith.constant 0 : index
    %4 = vector.load %arg3[%c1, %c0_5, %c0_6] : memref<2x256x256xf32, #tpu.memory_space<vmem>>, vector<1x256x256xf32>
    %5 = vector.shape_cast %4 : vector<1x256x256xf32> to vector<256x256xf32>
    %c0_7 = arith.constant 0 : index
    %c0_8 = arith.constant 0 : index
    %c0_9 = arith.constant 0 : index
    %6 = vector.load %arg4[%c0_7, %c0_8, %c0_9] : memref<1x1x256xf32, #tpu.memory_space<vmem>>, vector<1x1x256xf32>
    %7 = vector.shape_cast %6 : vector<1x1x256xf32> to vector<1x256xf32>
    %cst = arith.constant dense<0.000000e+00> : vector<4x256xf32>
    %8 = tpu.matmul %1, %3, %cst {dimension_numbers = #tpu.dot_dimension_numbers<[1], [0], [0], [1], [0, 0, 1, 1], [], []>} : vector<4x256xf32>, vector<256x256xf32>, vector<4x256xf32> -> vector<4x256xf32>
    %9 = vector.broadcast %7 : vector<1x256xf32> to vector<4x256xf32>
    %10 = arith.mulf %8, %9 : vector<4x256xf32>
    %cst_10 = arith.constant dense<0.000000e+00> : vector<4x256xf32>
    %11 = tpu.matmul %10, %5, %cst_10 {dimension_numbers = #tpu.dot_dimension_numbers<[1], [0], [0], [1], [0, 0, 1, 1], [], []>} : vector<4x256xf32>, vector<256x256xf32>, vector<4x256xf32> -> vector<4x256xf32>
    %c0_11 = arith.constant 0 : index
    %c0_12 = arith.constant 0 : index
    %c0_13 = arith.constant 0 : index
    %12 = vector.load %arg5[%c0_11, %c0_12, %c0_13] : memref<1x4x256xf32, #tpu.memory_space<vmem>>, vector<1x4x256xf32>
    %13 = vector.shape_cast %12 : vector<1x4x256xf32> to vector<4x256xf32>
    %14 = vector.shape_cast %11 : vector<4x256xf32> to vector<1x4x256xf32>
    tpu.vector_store %arg5[%c0_11, %c0_12, %c0_13], %14 {strides = array<i32>} : memref<1x4x256xf32, #tpu.memory_space<vmem>>, vector<1x4x256xf32>,
    return
  }
  func.func @transform_0(%arg0: i32, %arg1: i32) -> (i32, i32, i32) {
    %c0_i32 = arith.constant 0 : i32
    %c0_i32_0 = arith.constant 0 : i32
    return %arg0, %arg1, %c0_i32 : i32, i32, i32
  }
  func.func @transform_1(%arg0: i32, %arg1: i32) -> (i32, i32, i32) {
    %c0_i32 = arith.constant 0 : i32
    %c0_i32_0 = arith.constant 0 : i32
    %c0_i32_1 = arith.constant 0 : i32
    %c0_i32_2 = arith.constant 0 : i32
    return %c0_i32, %c0_i32_0, %c0_i32_1 : i32, i32, i32
  }
  func.func @transform_2(%arg0: i32, %arg1: i32) -> (i32, i32, i32) {
    %c0_i32 = arith.constant 0 : i32
    %c0_i32_0 = arith.constant 0 : i32
    %c0_i32_1 = arith.constant 0 : i32
    return %arg0, %c0_i32, %c0_i32_0 : i32, i32, i32
  }
  func.func @transform_3(%arg0: i32, %arg1: i32) -> (i32, i32, i32) {
    %c0_i32 = arith.constant 0 : i32
    %c0_i32_0 = arith.constant 0 : i32
    return %arg0, %arg1, %c0_i32 : i32, i32, i32
  }
}

</mosaic_0001>

<bundles_post_ra>
// kernel: tpu_custom_call.1
= control target key start
LH: loop header
LB: loop body
LE: loop exit
PB: predicated region body
PF: predicated region fallthrough
CT: control target
= control target key end

     0   :  { %8 = vsyncpa [#allocation3], 0  ;;  %s1188_s0 = inlined_call_operand.hbm [shape: f32[2,4,256], index: 0, kind: input, shape index: {}]   ;;  %s1189_s1 = inlined_call_operand.hbm [shape: f32[2,256,256], index: 1, kind: input, shape index: {}]   ;;  %s1190_s2 = inlined_call_operand.hbm [shape: f32[2,1,256], index: 2, kind: input, shape index: {}]   ;;  %s1191_s3 = inlined_call_operand.hbm [shape: f32[2,4,256], index: 3, kind: output, shape index: {}]  }
   0x1   :  { %10 = vsyncpa [#allocation3 + $0x1], 0 }
   0x2   :  { %11 = vsyncpa [#allocation6], 0 }
   0x3   :  { %12 = vsyncpa [#allocation4], 0 }
   0x4   :  { %14 = vsyncpa [#allocation4 + $0x1], 0  ;;  %s983_s12 = smov 0   ;;  %s985_s13 = smov 0  }
   0x5   :  { %s987_s14 = smov 0   ;;  %s989_s15 = smov 0  }
   0x6   :  { %s991_s16 = smov 0   ;;  %s993_s17 = smov 0  }
   0x7 LB: > { %s32_s18 = sadd.s32 1, %s951_s16  ;;  %s41_s19 = sadd.s32 1, %s943_s14  ;;  %s955_s17 = sphi %s993_s17, %s20_s17   ;;  %s951_s16 = sphi %s991_s16, %s1211_s16   ;;  %s947_s15 = sphi %s989_s15, %s1210_s15   ;;  %s943_s14 = sphi %s987_s14, %s1209_s14   ;;  %s939_s13 = sphi %s985_s13, %s1208_s13   ;;  %s935_s12 = sphi %s983_s12, %s1207_s12  }
   0x8   : > { %p34_p0 = scmp.ge.s32.totalorder %s32_s18, 2  ;;  %p48_p1 = scmp.ne.s32.totalorder %s943_s14, %s939_s13 }
   0x9   : > { %p49_p2 = scmp.eq.s32.totalorder %s955_s17, 0  ;;  %p730_p5 = scmp.lt.s32.totalorder %s955_s17, 2 }
   0xa   : > { %s1213_s18 = smov (%p34_p0, %s32_s18), 0  ;;  %s166_s21 = sand.u32 1, %s955_s17  }
   0xb   : > { %p50_p4 = por %p49_p2, %p48_p1  ;;  %s36_s20 = ssub.s32 %s951_s16, %s1213_s18 }
   0xc   : > { %p39_p6 = scmp.eq.s32.totalorder %s36_s20, 0  ;;  %s168_s22 = sand.u32 1, %s943_s14  }
   0xd   : > { %s701_s23 = sshll.u32 %s951_s16, 7  ;;  %s685_s25 = sshll.u32 %s168_s22, 3 }
   0xe   : > { %s1031_s24 = scalar_select %p39_p6, %s943_s14, %s41_s19  }
   0xf   : > { %s178_s28 = scalar_lea.hbm %s1188_s0, %s701_s23  ;;  %p1038_p7 = pnand %p730_p5, %p50_p4 }
  0x10   : > { %s170_s30 = scalar_lea.vmem [#allocation2], %s685_s25  ;;  %s1042_s5 = scalar_lea.sflag [#allocation3], %s166_s21 }
  0x11   : > { %s180_s4 = sshll.u32 %s170_s30, 4  ;;  %p1192_p8 = pneg %p1038_p7  ;;  %s181_s4 = int_to_ptr.vmem [resolvable:$true] %s180_s4 }
  0x12   : > { %s798_s6 = scalar_lea.vmem %s181_s4, 128  ;;  %s957_s7 = smov [#allocation2]  }
  0x13   : > { %p799_p9 = scmp.ne.s32.totalorder %s181_s4, %s798_s6  ;;  %s803_s8 = sshll.u32 %s957_s7, 4  ;;  %s804_s8 = int_to_ptr.vmem [resolvable:$false] %s803_s8 }
  0x14   : > { %s805_s9 = scalar_lea.vmem %s804_s8, 256  ;;  %p806_p12 = scmp.lt.s32.totalorder %s181_s4, %s804_s8 }
  0x15   : > { %p801_p10 = pnand %p799_p9, %p1192_p8  ;;  %p807_p13 = scmp.lt.s32.totalorder %s805_s9, %s798_s6 }
  0x17   : > { %p802_p11 = pneg %p801_p10  ;;  %p808_p0 = por %p807_p13, %p806_p12 }
  0x19   : > { %p809_p2 = pnand %p808_p0, %p802_p11 }
  0x1b   : > { %812 = shalt.err (!%p809_p2)
}
  0x1c   : > { %721 = dma.hbm_to_vmem [thread:$0]  (!%p1038_p7), %s178_s28, 128, %s181_s4, %s1042_s5  }
  0x1d   : > { %s1053_s10 = sadd.s32 4294967295, %s955_s17   ;;  %s681_s11 = sadd.s32 4294967294, %s955_s17  }
  0x1e   : > { %p54_p4 = scmp.ne.s32.totalorder %s939_s13, %s935_s12  ;;  %p1193_p5 = scmp.eq.s32.totalorder %s1053_s10, 0 }
  0x1f   : > { %p127_p6 = scmp.eq.s32.totalorder %s1053_s10, 1  ;;  %p133_p9 = scmp.eq.s32.totalorder %s681_s11, 1 }
  0x20   : > { %p1062_p10 = por %p1193_p5, %p54_p4  ;;  %p682_p11 = scmp.ge.s32.totalorder %s955_s17, 1 }
  0x21   : > { %p1070_p12 = por %p127_p6, %p48_p1  ;;  %p1074_p13 = por %p133_p9, %p54_p4 }
  0x22   : > { %p140_p0 = scmp.lt.s32.totalorder %s955_s17, 3  ;;  %s688_s23 = sshll.u32 %s168_s22, 1 }
  0x23   : > { %s1197_s20 = scalar_select %p1070_p12, 1, 0 }
  0x24   : > { %s1198_s21 = scalar_select %p1074_p13, 1, 0 }
  0x25   : > { %p1081_p2 = pnand %p682_p11, %p140_p0  ;;  %s958_s26 = smov [#allocation5]  }
  0x26   : > { %s152_s27 = sshll.u32 %s958_s26, 4  ;;  %s702_s28 = sshll.u32 %s951_s16, 5  ;;  %s153_s27 = int_to_ptr.vmem [resolvable:$true] %s152_s27 }
  0x27   : > { %p714_p1 = pneg %p1081_p2  ;;  %s191_s30 = scalar_lea.vmem [#allocation7], %s688_s23 }
  0x28   : > { %s199_s4 = sshll.u32 %s191_s30, 4  ;;  %s1097_s8 = scalar_lea.hbm %s1190_s2, %s702_s28  ;;  %s200_s4 = int_to_ptr.vmem [resolvable:$true] %s199_s4 }
  0x29   : > { %p1090_p4 = pnand %p714_p1, %p1193_p5  ;;  %s824_s9 = scalar_lea.vmem %s153_s27, 16384 }
  0x2a   : > { %p825_p9 = scmp.ne.s32.totalorder %s153_s27, %s824_s9  ;;  %p832_p3 = scmp.lt.s32.totalorder %s153_s27, %s153_s27 }
  0x2b   : > { %p815_p6 = pneg %p1090_p4  ;;  %p833_p8 = scmp.lt.s32.totalorder %s824_s9, %s824_s9 }
  0x2d   : > { %p827_p11 = pnand %p825_p9, %p815_p6  ;;  %p834_p13 = por %p833_p8, %p832_p3 }
  0x2f   : > { %p828_p0 = pneg %p827_p11 }
  0x31   : > { %p835_p1 = pnand %p834_p13, %p828_p0 }
  0x33   : > { %838 = shalt.err (!%p835_p1)
}
  0x34   : > { %s959_s11 = smov 256   ;;  %s960_s23 = smov 16  }
  0x35   : > { %717 = dma.hbm_to_vmem [thread:$0]  (!%p1090_p4), %s1189_s1, 16384, %s153_s27, [#allocation6], %s959_s11, %s959_s11, %s960_s23  }
  0x36   : > { %s852_s30 = scalar_lea.vmem %s200_s4, 32  ;;  %p1201_p12 = pneg %p1038_p7 }
  0x37   : > { %p853_p5 = scmp.ne.s32.totalorder %s200_s4, %s852_s30  ;;  %s961_s7 = smov [#allocation7]  }
  0x38   : > { %s857_s22 = sshll.u32 %s961_s7, 4  ;;  %s858_s22 = int_to_ptr.vmem [resolvable:$false] %s857_s22 }
  0x39   : > { %p855_p6 = pnand %p853_p5, %p1201_p12  ;;  %s859_s9 = scalar_lea.vmem %s858_s22, 64 }
  0x3a   : > { %p860_p3 = scmp.lt.s32.totalorder %s200_s4, %s858_s22  ;;  %p861_p8 = scmp.lt.s32.totalorder %s859_s9, %s852_s30 }
  0x3b   : > { %p856_p9 = pneg %p855_p6 }
  0x3c   : > { %p862_p13 = por %p861_p8, %p860_p3 }
  0x3e   : > { %p863_p11 = pnand %p862_p13, %p856_p9 }
  0x40   : > { %866 = shalt.err (!%p863_p11)
}
  0x41   : > { %724 = dma.hbm_to_vmem [thread:$0]  (!%p1038_p7), %s1097_s8, 32, %s200_s4, %s1042_s5  }
  0x42   : > { %208 = sbr.rel (%p1081_p2) target bundleno = 551 (0x227), region = 32  ;;  %s210_s27 = sand.u32 (!%p1081_p2), 1, %s1053_s10  }
  0x43   : > { %s1117_s6 = sand.u32 (!%p1081_p2), 1, %s939_s13   ;;  %s211_s23 = scalar_lea.sflag (!%p1081_p2), [#allocation3], %s210_s27 }
  0x44   : > { %s692_s11 = sshll.u32 (!%p1081_p2), %s1117_s6, 3 }
  0x45   : > { %s1122_s26 = scalar_lea.vmem (!%p1081_p2), [#allocation2], %s692_s11 }
  0x47   : > { %918 = dma.done.wait (%p1062_p10), %s211_s23, 128  }
  0x48   : > { %920 = vsyncadd (%p1062_p10), %s211_s23, 4294967168  ;;  %p1202_p7 = scmp.eq.s32.totalorder %s1053_s10, 0 }
  0x4a   : > { %922 = dma.done.wait (%p1202_p7), [#allocation6], 16384   ;;  %p1203_p5 = pmov %p1202_p7 }
  0x4b   : > { %s694_s29 = sshll.u32 %s1117_s6, 1 }
  0x4c   : > { %924 = vsyncadd (%p1203_p5), [#allocation6], 4294950912  ;;  %s1133_s5 = scalar_lea.vmem [#allocation7], %s694_s29 }
  0x4d   : > { %926 = dma.done.wait (%p1062_p10), %s211_s23, 32  }
  0x4e   : > { %928 = vsyncadd (%p1062_p10), %s211_s23, 4294967264  ;;  %v287_v0 = vld [vmem:[#allocation5 + $0xf8] sm:$0xff]  ;;  %v286_v1 = vld [vmem:[#allocation5 + $0xf0] sm:$0xff]  ;;  %s703_s10 = sshll.u32 %s947_s15, 7  ;;  %s254_s19 = scalar_lea.vmem [#allocation8], %s692_s11 }
  0x4f   : > { %v285_v2 = vld [vmem:[#allocation5 + $0xe8] sm:$0xff]  ;;  %389 = vmatprep.subr.mxu0 %v287_v0  ;;  %v284_v3 = vld [vmem:[#allocation5 + $0xe0] sm:$0xff]  ;;  %v283_v4 = vld [vmem:[#allocation5 + $0xd8] sm:$0xff]  ;;  %s566_s25 = sshll.u32 %s254_s19, 4  ;;  %s564_s28 = scalar_lea.hbm %s1191_s3, %s703_s10  ;;  %s567_s25 = int_to_ptr.vmem [resolvable:$true] %s566_s25 }
  0x50   : > { %390 = vmatpush1.msra.mxu0 %v286_v1  ;;  %v282_v5 = vld [vmem:[#allocation5 + $0xd0] sm:$0xff]  ;;  %v281_v6 = vld [vmem:[#allocation5 + $0xc8] sm:$0xff]  ;;  %v280_v7 = vld [vmem:[#allocation5 + $0xc0] sm:$0xff]  ;;  %s550_s30 = scalar_lea.sflag [#allocation4], %s1117_s6  ;;  %s867_s7 = scalar_lea.vmem %s567_s25, 128 }
  0x51   : > { %391 = vmatprep.subr.mxu0 %v285_v2  ;;  %v279_v8 = vld [vmem:[#allocation5 + $0xb8] sm:$0xff]  ;;  %v278_v9 = vld [vmem:[#allocation5 + $0xb0] sm:$0xff]  ;;  %v277_v10 = vld [vmem:[#allocation5 + $0xa8] sm:$0xff]  ;;  %p868_p10 = scmp.ne.s32.totalorder %s567_s25, %s867_s7  ;;  %p1204_p12 = scmp.ne.s32.totalorder %s1197_s20, 0 }
  0x52   : > { %392 = vmatpush1.msra.mxu0 %v284_v3  ;;  %v276_v11 = vld [vmem:[#allocation5 + $0xa0] sm:$0xff]  ;;  %v275_v12 = vld [vmem:[#allocation5 + $0x98] sm:$0xff]  ;;  %v274_v13 = vld [vmem:[#allocation5 + $0x90] sm:$0xff]  ;;  %s962_s22 = smov [#allocation8]  }
  0x53   : > { %393 = vmatprep.subr.mxu0 %v283_v4  ;;  %v273_v14 = vld [vmem:[#allocation5 + $0x88] sm:$0xff]  ;;  %v272_v15 = vld [vmem:[#allocation5 + $0x80] sm:$0xff]  ;;  %v271_v16 = vld [vmem:[#allocation5 + $0x78] sm:$0xff]  ;;  %p869_p2 = pnand %p868_p10, %p1204_p12  ;;  %s871_s9 = sshll.u32 %s962_s22, 4  ;;  %s872_s9 = int_to_ptr.vmem [resolvable:$false] %s871_s9 }
  0x54   : > { %394 = vmatpush1.msra.mxu0 %v282_v5  ;;  %v270_v17 = vld [vmem:[#allocation5 + $0x70] sm:$0xff]  ;;  %v269_v18 = vld [vmem:[#allocation5 + $0x68] sm:$0xff]  ;;  %v268_v19 = vld [vmem:[#allocation5 + $0x60] sm:$0xff]  ;;  %s873_s15 = scalar_lea.vmem %s872_s9, 256  ;;  %p874_p0 = scmp.lt.s32.totalorder %s567_s25, %s872_s9 }
  0x55   : > { %395 = vmatprep.subr.mxu0 %v281_v6  ;;  %v267_v20 = vld [vmem:[#allocation5 + $0x58] sm:$0xff]  ;;  %v266_v21 = vld [vmem:[#allocation5 + $0x50] sm:$0xff]  ;;  %v265_v22 = vld [vmem:[#allocation5 + $0x48] sm:$0xff]  ;;  %p870_p4 = pneg %p869_p2  ;;  %p875_p1 = scmp.lt.s32.totalorder %s873_s15, %s867_s7 }
  0x56   : > { %396 = vmatpush1.msra.mxu0 %v280_v7  ;;  %v264_v23 = vld [vmem:[#allocation5 + $0x40] sm:$0xff]  ;;  %v1140_v24 = vld [vmem:[%s1122_s26] sm:$0xff]  ;;  %v350_v29 = vld [vmem:[#allocation5 + $0x2e8] sm:$0xff] }
  0x57   : > { %397 = vmatprep.subr.mxu0 %v279_v8  ;;  %v352_v25 = vld [vmem:[#allocation5 + $0x2f8] sm:$0xff]  ;;  %v387_v27 = vcombine.high %v1140_v24, %v1140_v24  ;;  %v351_v28 = vld [vmem:[#allocation5 + $0x2f0] sm:$0xff]  ;;  %v349_v31 = vld [vmem:[#allocation5 + $0x2e0] sm:$0xff]  ;;  %p876_p6 = por %p875_p1, %p874_p0 }
  0x58   : > { %398 = vmatpush1.msra.mxu0 %v278_v9  ;;  %v263_v26 = vld [vmem:[#allocation5 + $0x38] sm:$0xff]  ;;  %473 = vmatprep.subr.mxu1 %v352_v25  ;;  %v262_v30 = vld [vmem:[#allocation5 + $0x30] sm:$0xff]  ;;  %v261_v32 = vld [vmem:[#allocation5 + $0x28] sm:$0xff] }
  0x59   : > { %399 = vmatprep.subr.mxu0 %v277_v10  ;;  %474 = vmatpush1.msra.mxu1 %v351_v28  ;;  %v348_v33 = vld [vmem:[#allocation5 + $0x2d8] sm:$0xff]  ;;  %v260_v34 = vld [vmem:[#allocation5 + $0x20] sm:$0xff]  ;;  %v347_v35 = vld [vmem:[#allocation5 + $0x2d0] sm:$0xff]  ;;  %p877_p9 = pnand %p876_p6, %p870_p4 }
  0x5a   : > { %400 = vmatpush1.msra.mxu0 %v276_v11  ;;  %453 = vmatprep.mubr.f32.mxu0 %v387_v27  ;;  %v259_v36 = vld [vmem:[#allocation5 + $0x18] sm:$0xff]  ;;  %v346_v37 = vld [vmem:[#allocation5 + $0x2c8] sm:$0xff]  ;;  %v258_v38 = vld [vmem:[#allocation5 + $0x10] sm:$0xff] }
  0x5b   : > { %401 = vmatprep.subr.mxu0 %v275_v12  ;;  %475 = vmatprep.subr.mxu1 %v350_v29  ;;  %v345_v39 = vld [vmem:[#allocation5 + $0x2c0] sm:$0xff]  ;;  %v257_v40 = vld [vmem:[#allocation5 + $0x8] sm:$0xff]  ;;  %v344_v41 = vld [vmem:[#allocation5 + $0x2b8] sm:$0xff] }
  0x5c   : > { %402 = vmatpush1.msra.mxu0 %v274_v13  ;;  %476 = vmatpush1.msra.mxu1 %v349_v31  ;;  %v256_v42 = vld [vmem:[#allocation5] sm:$0xff]  ;;  %v343_v43 = vld [vmem:[#allocation5 + $0x2b0] sm:$0xff]  ;;  %v319_v44 = vld [vmem:[#allocation5 + $0x1f8] sm:$0xff] }
  0x5d   : > { %403 = vmatprep.subr.mxu0 %v273_v14  ;;  %477 = vmatprep.subr.mxu1 %v348_v33  ;;  %v342_v45 = vld [vmem:[#allocation5 + $0x2a8] sm:$0xff]  ;;  %v318_v46 = vld [vmem:[#allocation5 + $0x1f0] sm:$0xff]  ;;  %v341_v47 = vld [vmem:[#allocation5 + $0x2a0] sm:$0xff] }
  0x5e   : > { %404 = vmatpush1.msra.mxu0 %v272_v15  ;;  %478 = vmatpush1.msra.mxu1 %v347_v35  ;;  %v317_v48 = vld [vmem:[#allocation5 + $0x1e8] sm:$0xff]  ;;  %v340_v49 = vld [vmem:[#allocation5 + $0x298] sm:$0xff]  ;;  %v316_v50 = vld [vmem:[#allocation5 + $0x1e0] sm:$0xff] }
  0x5f   : > { %405 = vmatprep.subr.mxu0 %v271_v16  ;;  %479 = vmatprep.subr.mxu1 %v346_v37  ;;  %v339_v51 = vld [vmem:[#allocation5 + $0x290] sm:$0xff]  ;;  %v315_v52 = vld [vmem:[#allocation5 + $0x1d8] sm:$0xff]  ;;  %v338_v53 = vld [vmem:[#allocation5 + $0x288] sm:$0xff] }
  0x60   : > { %406 = vmatpush1.msra.mxu0 %v270_v17  ;;  %480 = vmatpush1.msra.mxu1 %v345_v39  ;;  %v314_v54 = vld [vmem:[#allocation5 + $0x1d0] sm:$0xff]  ;;  %v337_v55 = vld [vmem:[#allocation5 + $0x280] sm:$0xff]  ;;  %v313_v56 = vld [vmem:[#allocation5 + $0x1c8] sm:$0xff] }
  0x61   : > { %407 = vmatprep.subr.mxu0 %v269_v18  ;;  %481 = vmatprep.subr.mxu1 %v344_v41  ;;  %v336_v57 = vld [vmem:[#allocation5 + $0x278] sm:$0xff]  ;;  %v312_v58 = vld [vmem:[#allocation5 + $0x1c0] sm:$0xff]  ;;  %v335_v59 = vld [vmem:[#allocation5 + $0x270] sm:$0xff] }
  0x62   : > { %408 = vmatpush1.msra.mxu0 %v268_v19  ;;  %482 = vmatpush1.msra.mxu1 %v343_v43  ;;  %v311_v60 = vld [vmem:[#allocation5 + $0x1b8] sm:$0xff]  ;;  %v334_v61 = vld [vmem:[#allocation5 + $0x268] sm:$0xff]  ;;  %v310_v62 = vld [vmem:[#allocation5 + $0x1b0] sm:$0xff] }
  0x63   : > { %409 = vmatprep.subr.mxu0 %v267_v20  ;;  %483 = vmatprep.subr.mxu1 %v342_v45  ;;  %v333_v63 = vld [vmem:[#allocation5 + $0x260] sm:$0xff]  ;;  %v309_v0 = vld [vmem:[#allocation5 + $0x1a8] sm:$0xff]  ;;  %v332_v1 = vld [vmem:[#allocation5 + $0x258] sm:$0xff] }
  0x64   : > { %410 = vmatpush1.msra.mxu0 %v266_v21  ;;  %484 = vmatpush1.msra.mxu1 %v341_v47  ;;  %v308_v2 = vld [vmem:[#allocation5 + $0x1a0] sm:$0xff]  ;;  %v331_v3 = vld [vmem:[#allocation5 + $0x250] sm:$0xff]  ;;  %v307_v4 = vld [vmem:[#allocation5 + $0x198] sm:$0xff] }
  0x65   : > { %411 = vmatprep.subr.mxu0 %v265_v22  ;;  %485 = vmatprep.subr.mxu1 %v340_v49  ;;  %v330_v5 = vld [vmem:[#allocation5 + $0x248] sm:$0xff]  ;;  %v306_v6 = vld [vmem:[#allocation5 + $0x190] sm:$0xff]  ;;  %v329_v7 = vld [vmem:[#allocation5 + $0x240] sm:$0xff] }
  0x66   : > { %412 = vmatpush1.msra.mxu0 %v264_v23  ;;  %486 = vmatpush1.msra.mxu1 %v339_v51  ;;  %v305_v8 = vld [vmem:[#allocation5 + $0x188] sm:$0xff]  ;;  %v328_v9 = vld [vmem:[#allocation5 + $0x238] sm:$0xff]  ;;  %v304_v10 = vld [vmem:[#allocation5 + $0x180] sm:$0xff] }
  0x67   : > { %413 = vmatprep.subr.mxu0 %v263_v26  ;;  %487 = vmatprep.subr.mxu1 %v338_v53  ;;  %v327_v11 = vld [vmem:[#allocation5 + $0x230] sm:$0xff]  ;;  %v303_v12 = vld [vmem:[#allocation5 + $0x178] sm:$0xff]  ;;  %v326_v13 = vld [vmem:[#allocation5 + $0x228] sm:$0xff] }
  0x68   : > { %414 = vmatpush1.msra.mxu0 %v262_v30  ;;  %488 = vmatpush1.msra.mxu1 %v337_v55  ;;  %v302_v14 = vld [vmem:[#allocation5 + $0x170] sm:$0xff]  ;;  %v325_v15 = vld [vmem:[#allocation5 + $0x220] sm:$0xff]  ;;  %v301_v16 = vld [vmem:[#allocation5 + $0x168] sm:$0xff] }
  0x69   : > { %415 = vmatprep.subr.mxu0 %v261_v32  ;;  %489 = vmatprep.subr.mxu1 %v336_v57  ;;  %v324_v17 = vld [vmem:[#allocation5 + $0x218] sm:$0xff]  ;;  %v300_v18 = vld [vmem:[#allocation5 + $0x160] sm:$0xff]  ;;  %v323_v19 = vld [vmem:[#allocation5 + $0x210] sm:$0xff] }
  0x6a   : > { %416 = vmatpush1.msra.mxu0 %v260_v34  ;;  %490 = vmatpush1.msra.mxu1 %v335_v59  ;;  %v299_v20 = vld [vmem:[#allocation5 + $0x158] sm:$0xff]  ;;  %v322_v21 = vld [vmem:[#allocation5 + $0x208] sm:$0xff]  ;;  %v298_v22 = vld [vmem:[#allocation5 + $0x150] sm:$0xff] }
  0x6b   : > { %417 = vmatprep.subr.mxu0 %v259_v36  ;;  %491 = vmatprep.subr.mxu1 %v334_v61  ;;  %v321_v23 = vld [vmem:[#allocation5 + $0x200] sm:$0xff]  ;;  %v297_v25 = vld [vmem:[#allocation5 + $0x148] sm:$0xff]  ;;  %v384_v26 = vld [vmem:[#allocation5 + $0x3f8] sm:$0xff] }
  0x6c   : > { %418 = vmatpush1.msra.mxu0 %v258_v38  ;;  %492 = vmatpush1.msra.mxu1 %v333_v63  ;;  %v296_v27 = vld [vmem:[#allocation5 + $0x140] sm:$0xff]  ;;  %v383_v28 = vld [vmem:[#allocation5 + $0x3f0] sm:$0xff]  ;;  %v295_v29 = vld [vmem:[#allocation5 + $0x138] sm:$0xff] }
  0x6d   : > { %419 = vmatprep.subr.mxu0 %v257_v40  ;;  %493 = vmatprep.subr.mxu1 %v332_v1  ;;  %v382_v30 = vld [vmem:[#allocation5 + $0x3e8] sm:$0xff]  ;;  %v294_v31 = vld [vmem:[#allocation5 + $0x130] sm:$0xff]  ;;  %v381_v32 = vld [vmem:[#allocation5 + $0x3e0] sm:$0xff] }
  0x6e   : > { %420 = vmatpush1.msra.mxu0 %v256_v42  ;;  %494 = vmatpush1.msra.mxu1 %v331_v3  ;;  %v293_v33 = vld [vmem:[#allocation5 + $0x128] sm:$0xff]  ;;  %v380_v34 = vld [vmem:[#allocation5 + $0x3d8] sm:$0xff]  ;;  %v292_v35 = vld [vmem:[#allocation5 + $0x120] sm:$0xff] }
  0x6f   : > { %421 = vmatprep.subr.mxu0 %v319_v44  ;;  %495 = vmatprep.subr.mxu1 %v330_v5  ;;  %v379_v36 = vld [vmem:[#allocation5 + $0x3d0] sm:$0xff]  ;;  %v291_v37 = vld [vmem:[#allocation5 + $0x118] sm:$0xff]  ;;  %v378_v38 = vld [vmem:[#allocation5 + $0x3c8] sm:$0xff] }
  0x70   : > { %422 = vmatpush2.msra.mxu0 %v318_v46  ;;  %496 = vmatpush1.msra.mxu1 %v329_v7  ;;  %v290_v39 = vld [vmem:[#allocation5 + $0x110] sm:$0xff]  ;;  %v377_v40 = vld [vmem:[#allocation5 + $0x3c0] sm:$0xff]  ;;  %v289_v41 = vld [vmem:[#allocation5 + $0x108] sm:$0xff] }
  0x71   : > { %423 = vmatprep.subr.mxu0 %v317_v48  ;;  %497 = vmatprep.subr.mxu1 %v328_v9  ;;  %v376_v42 = vld [vmem:[#allocation5 + $0x3b8] sm:$0xff]  ;;  %v288_v43 = vld [vmem:[#allocation5 + $0x100] sm:$0xff]  ;;  %v375_v44 = vld [vmem:[#allocation5 + $0x3b0] sm:$0xff] }
  0x72   : > { %424 = vmatpush2.msra.mxu0 %v316_v50  ;;  %498 = vmatpush1.msra.mxu1 %v327_v11  ;;  %v374_v45 = vld [vmem:[#allocation5 + $0x3a8] sm:$0xff]  ;;  %v373_v46 = vld [vmem:[#allocation5 + $0x3a0] sm:$0xff]  ;;  %v372_v47 = vld [vmem:[#allocation5 + $0x398] sm:$0xff] }
  0x73   : > { %425 = vmatprep.subr.mxu0 %v315_v52  ;;  %499 = vmatprep.subr.mxu1 %v326_v13  ;;  %v371_v48 = vld [vmem:[#allocation5 + $0x390] sm:$0xff]  ;;  %v370_v49 = vld [vmem:[#allocation5 + $0x388] sm:$0xff]  ;;  %v369_v50 = vld [vmem:[#allocation5 + $0x380] sm:$0xff] }
  0x74   : > { %426 = vmatpush2.msra.mxu0 %v314_v54  ;;  %500 = vmatpush1.msra.mxu1 %v325_v15  ;;  %v368_v51 = vld [vmem:[#allocation5 + $0x378] sm:$0xff]  ;;  %v367_v52 = vld [vmem:[#allocation5 + $0x370] sm:$0xff]  ;;  %v366_v53 = vld [vmem:[#allocation5 + $0x368] sm:$0xff] }
  0x75   : > { %427 = vmatprep.subr.mxu0 %v313_v56  ;;  %501 = vmatprep.subr.mxu1 %v324_v17  ;;  %v365_v54 = vld [vmem:[#allocation5 + $0x360] sm:$0xff]  ;;  %v364_v55 = vld [vmem:[#allocation5 + $0x358] sm:$0xff]  ;;  %v363_v56 = vld [vmem:[#allocation5 + $0x350] sm:$0xff] }
  0x76   : > { %428 = vmatpush2.msra.mxu0 %v312_v58  ;;  %502 = vmatpush1.msra.mxu1 %v323_v19  ;;  %v361_v57 = vld [vmem:[#allocation5 + $0x340] sm:$0xff]  ;;  %v360_v58 = vld [vmem:[#allocation5 + $0x338] sm:$0xff]  ;;  %v359_v59 = vld [vmem:[#allocation5 + $0x330] sm:$0xff] }
  0x77   : > { %429 = vmatprep.subr.mxu0 %v311_v60  ;;  %503 = vmatprep.subr.mxu1 %v322_v21  ;;  %v358_v60 = vld [vmem:[#allocation5 + $0x328] sm:$0xff]  ;;  %v357_v61 = vld [vmem:[#allocation5 + $0x320] sm:$0xff]  ;;  %v355_v63 = vld [vmem:[#allocation5 + $0x310] sm:$0xff] }
  0x78   : > { %430 = vmatpush2.msra.mxu0 %v310_v62  ;;  %504 = vmatpush1.msra.mxu1 %v321_v23  ;;  %v356_v62 = vld [vmem:[#allocation5 + $0x318] sm:$0xff]  ;;  %v353_v1 = vld [vmem:[#allocation5 + $0x300] sm:$0xff] }
  0x79   : > { %431 = vmatprep.subr.mxu0 %v309_v0  ;;  %505 = vmatprep.subr.mxu1 %v384_v26  ;;  %v354_v0 = vld [vmem:[#allocation5 + $0x308] sm:$0xff] }
  0x7a   : > { %432 = vmatpush2.msra.mxu0 %v308_v2  ;;  %506 = vmatpush2.msra.mxu1 %v383_v28  ;;  %v461_v2 = vlaneseq }
  0x7b   : > { %433 = vmatprep.subr.mxu0 %v307_v4  ;;  %507 = vmatprep.subr.mxu1 %v382_v30 }
  0x7c   : > { %434 = vmatpush2.msra.mxu0 %v306_v6  ;;  %508 = vmatpush2.msra.mxu1 %v381_v32  ;;  %v462_v3 = vshrl.u32 %v461_v2, 7  ;;  %v385_v6 = vld [vmem:[%s1133_s5] sm:$0x3] }
  0x7d   : > { %435 = vmatprep.subr.mxu0 %v305_v8  ;;  %509 = vmatprep.subr.mxu1 %v380_v34 }
  0x7e   : > { %436 = vmatpush2.msra.mxu0 %v304_v10  ;;  %510 = vmatpush2.msra.mxu1 %v379_v36  ;;  %v467_v4 = vsub.s32 1, %v462_v3  ;;  %v463_v5 = vsub.s32 0, %v462_v3 }
  0x7f   : > { %437 = vmatprep.subr.mxu0 %v303_v12  ;;  %511 = vmatprep.subr.mxu1 %v378_v38 }
  0x80   : > { %438 = vmatpush2.msra.mxu0 %v302_v14  ;;  %512 = vmatpush2.msra.mxu1 %v377_v40  ;;  %v468_v7 = vrot.slane %v385_v6, %v467_v4  ;;  %v464_v9 = vrot.slane %v385_v6, %v463_v5 }
  0x81   : > { %439 = vmatprep.subr.mxu0 %v301_v16  ;;  %513 = vmatprep.subr.mxu1 %v376_v42 }
  0x82   : > { %440 = vmatpush2.msra.mxu0 %v300_v18  ;;  %514 = vmatpush2.msra.mxu1 %v375_v44 }
  0x83   : > { %441 = vmatprep.subr.mxu0 %v299_v20  ;;  %515 = vmatprep.subr.mxu1 %v374_v45 }
  0x84   : > { %442 = vmatpush2.msra.mxu0 %v298_v22  ;;  %516 = vmatpush2.msra.mxu1 %v373_v46 }
  0x85   : > { %443 = vmatprep.subr.mxu0 %v297_v25  ;;  %517 = vmatprep.subr.mxu1 %v372_v47 }
  0x86   : > { %444 = vmatpush2.msra.mxu0 %v296_v27  ;;  %518 = vmatpush2.msra.mxu1 %v371_v48 }
  0x87   : > { %445 = vmatprep.subr.mxu0 %v295_v29  ;;  %519 = vmatprep.subr.mxu1 %v370_v49 }
  0x88   : > { %446 = vmatpush2.msra.mxu0 %v294_v31  ;;  %520 = vmatpush2.msra.mxu1 %v369_v50 }
  0x89   : > { %447 = vmatprep.subr.mxu0 %v293_v33  ;;  %521 = vmatprep.subr.mxu1 %v368_v51 }
  0x8a   : > { %448 = vmatpush2.msra.mxu0 %v292_v35  ;;  %522 = vmatpush2.msra.mxu1 %v367_v52 }
  0x8b   : > { %449 = vmatprep.subr.mxu0 %v291_v37  ;;  %523 = vmatprep.subr.mxu1 %v366_v53 }
  0x8c   : > { %450 = vmatpush2.msra.mxu0 %v290_v39  ;;  %524 = vmatpush2.msra.mxu1 %v365_v54 }
  0x8d   : > { %451 = vmatprep.subr.mxu0 %v289_v41  ;;  %525 = vmatprep.subr.mxu1 %v364_v55 }
  0x8e   : > { %452 = vmatpush2.msra.mxu0 %v288_v43  ;;  %526 = vmatpush2.msra.mxu1 %v363_v56 }
  0x8f   : > { %454 = vmatmul.mubr.f32.vlgmr.msra.gmra.mxu0 %v1140_v24  ;;  %v362_v24 = vld [vmem:[#allocation5 + $0x348] sm:$0xff] }
  0x90   : > { %527 = vmatprep.subr.mxu1 %v362_v24 }
  0x91   : > { %528 = vmatpush2.msra.mxu1 %v361_v57 }
  0x92   : > { %529 = vmatprep.subr.mxu1 %v360_v58 }
  0x93   : > { %530 = vmatpush2.msra.mxu1 %v359_v59 }
  0x94   : > { %531 = vmatprep.subr.mxu1 %v358_v60 }
  0x95   : > { %532 = vmatpush2.msra.mxu1 %v357_v61 }
  0x96   : > { %533 = vmatprep.subr.mxu1 %v356_v62 }
  0x97   : > { %534 = vmatpush2.msra.mxu1 %v355_v63 }
  0x98   : > { %535 = vmatprep.subr.mxu1 %v354_v0 }
  0x99   : > { %536 = vmatpush2.msra.mxu1 %v353_v1 }
 0x14f   : > { %v455_v8 = vpop.f32.mrf.mxu0 }
 0x150   : > { %v471_v12 = vmul.f32 %v464_v9, %v455_v8 }
 0x151   : > { %v457_v10 = vpop.f32.mrf.mxu0 }
 0x152   : > { %v472_v11 = vmul.f32 %v468_v7, %v457_v10 }
 0x154   : > { %537 = vmatprep.mubr.f32.mxu1 %v472_v11 }
 0x155   : > { %538 = vmatmul.mubr.f32.vlgmr.msra.gmra.mxu1 %v471_v12 }
 0x215   : > { %v539_v13 = vpop.f32.mrf.mxu1 }
 0x217   : > { %v541_v14 = vpop.f32.mrf.mxu1 }
 0x218   : > { %v546_v15 = vcombine.low %v539_v13, %v541_v14 }
 0x21a   : > { %548 = vst [vmem:[%s254_s19] sm:$0xff] %v546_v15 }
 0x21b   : > { %880 = shalt.err (!%p877_p9)
}
 0x21c   : > { %s881_s27 = scalar_lea.hbm %s564_s28, 128  ;;  %s885_s23 = scalar_lea.hbm %s1191_s3, 256 }
 0x21d   : > { %p882_p3 = scmp.ne.s32.totalorder %s564_s28, %s881_s27  ;;  %p886_p11 = scmp.lt.s32.totalorder %s564_s28, %s1191_s3 }
 0x21e   : > { %p887_p7 = scmp.lt.s32.totalorder %s885_s23, %s881_s27 }
 0x21f   : > { %p883_p8 = pnand %p882_p3, %p1204_p12 }
 0x220   : > { %p888_p5 = por %p887_p7, %p886_p11 }
 0x221   : > { %p884_p13 = pneg %p883_p8 }
 0x223   : > { %p889_p10 = pnand %p888_p5, %p884_p13 }
 0x225   : > { %892 = shalt.err (!%p889_p10)
}
 0x226   : > { %712 = dma.vmem_to_hbm [thread:$0]  (%p1204_p12), %s567_s25, 128, %s564_s28, %s550_s30  }
 0x227 PF: > { %s578_s5 = sand.u32 1, %s935_s12   ;;  %p1205_p2 = scmp.ne.s32.totalorder %s1198_s21, 0 }
 0x228   : > { %p1206_p4 = scmp.ge.s32.totalorder %s955_s17, 2  ;;  %s579_s10 = scalar_lea.sflag [#allocation4], %s578_s5 }
 0x22a   : > { %p726_p0 = pnand %p1206_p4, %p1205_p2 }
 0x22c   : > { %p727_p1 = pneg %p726_p0 }
 0x22e   : > { %930 = dma.done.wait (%p727_p1), %s579_s10, 128  }
 0x22f   : > { %932 = vsyncadd (%p727_p1), %s579_s10, 4294967168  ;;  %s20_s17 = sadd.s32 1, %s955_s17   ;;  %s1207_s12 = smov %s939_s13 }
 0x230   : > { %p17_p6 = scmp.ge.s32.totalorder %s20_s17, 4   ;;  %s1208_s13 = smov %s943_s14 }
 0x231   : > { %s1209_s14 = smov %s1031_s24  ;;  %s1210_s15 = smov %s951_s16 }
 0x232   : > { %s1211_s16 = smov %s1213_s18  ;;  %19 = sbr.rel (!%p17_p6) target bundleno = 7 (0x7), region = 93 }
 0x237   :  { %584 = vsyncpa [#allocation3], 1 }
 0x238   :  { %586 = vsyncpa [#allocation3 + $0x1], 1 }
 0x239   :  { %587 = vsyncpa [#allocation6], 1 }
 0x23a   :  { %588 = vsyncpa [#allocation4], 1 }
 0x23b   :  { %590 = vsyncpa [#allocation4 + $0x1], 1 }

</bundles_post_ra>
